<compile_context>
chip_gen: v7x
topology: tpu7x:2x2x1
jax: 0.10.0
libtpu: 0.0.40
codegen_flags: <defaults>
</compile_context>

<pallas_src>
import functools
import math
from typing import NamedTuple

import jax
import jax.numpy as jnp
from jax.experimental import pallas as pl
from jax.experimental.pallas import tpu as pltpu

_MIB = 1024 * 1024


def _round_up(a: int, b: int) -> int:
    return ((a + b - 1) // b) * b


def _chip_defaults():
    """Per-generation (tm, tf, tm_align, vmem cap) picked against the HBM roofline."""
    kind = ""
    try:
        kind = jax.devices()[0].device_kind.lower()
    except Exception:  # pragma: no cover - defensive
        pass
    if "v5 lite" in kind or "v5lite" in kind or "v5e" in kind:
        # knee ~ 197 TF/s / 0.82 TB/s ~= 240 flops/byte; 128 MiB VMEM; 4x128 MXU.
        return dict(tm=512, tf=1024, tm_align=128, vmem_cap=100 * _MIB)
    if "v6" in kind:
        # knee ~ 918 TF/s / 1.4 TB/s ~= 640 flops/byte; 128 MiB VMEM.
        return dict(tm=1024, tf=512, tm_align=256, vmem_cap=100 * _MIB)
    if "v7" in kind or "7x" in kind:
        # per-TC knee ~ 996 TF/s / ~3.2 TB/s ~= 310 flops/byte; only 64 MiB VMEM/TC,
        # so cap the scoped limit well below physical to leave Mosaic headroom.
        return dict(tm=512, tf=512, tm_align=256, vmem_cap=48 * _MIB)
    # Unknown chip: conservative settings that fit a 64 MiB VMEM budget.
    return dict(tm=512, tf=512, tm_align=256, vmem_cap=48 * _MIB)


def _vmem_limit_bytes(tm, tf, hidden, in_isz, out_isz, cap):
    """Scoped-VMEM limit derived from the actual tile footprint, capped per chip."""
    footprint = (
        2 * tm * hidden * in_isz      # x row tile (double-buffered)
        + 2 * hidden * tf * in_isz    # W1 ff tile (double-buffered)
        + 2 * tf * hidden * in_isz    # W2 ff tile (double-buffered)
        + 2 * tm * hidden * out_isz   # output tile (double-buffered)
        + tm * hidden * 4             # f32 accumulator scratch
        + 2 * tm * tf * 4             # h / gelu(h) internal intermediates (f32)
        + 4 * (tf + hidden) * 4       # biases
    )
    return int(min(cap, max(footprint + 8 * _MIB, 24 * _MIB)))


def mlp_kernel(x_ref, w1_ref, b1_ref, w2_ref, b2_ref, o_ref, acc_ref, *,
               approximate_gelu: bool):
    # Grid: (row tiles, ff tiles).  Axis 1 (ff) is the reduction/accumulation axis.
    k = pl.program_id(1)

    # fc1 partial: (tm, tf) = x @ W1[:, k-tile] + b1[k-tile]  (MXU, f32 accumulate).
    h = jnp.dot(x_ref[...], w1_ref[...], preferred_element_type=jnp.float32)
    h = h + b1_ref[...]

    # GELU in f32.  NOTE: on v6e/v7x the tanh path could run in bf16 (bf16 VPU/EUP)
    # to halve VPU work and internal scratch; kept f32 for v5e portability and
    # because the default exact-erf parity path needs f32 anyway.
    if approximate_gelu:
        c = jnp.float32(math.sqrt(2.0 / math.pi))
        g = 0.5 * h * (1.0 + jnp.tanh(c * (h + 0.044715 * (h * h * h))))
    else:
        g = 0.5 * h * (1.0 + jax.lax.erf(h * jnp.float32(1.0 / math.sqrt(2.0))))

    # TODO(synk): training-mode dropout would mask `g` here via pltpu.prng_seed /
    # pltpu.prng_random_bits; inference (nn.Dropout in eval) is the identity.

    # fc2 partial: gelu(h) @ W2[k-tile, :]  into the resident f32 accumulator.
    partial_out = jnp.dot(g.astype(w2_ref.dtype), w2_ref[...],
                          preferred_element_type=jnp.float32)

    @pl.when(k == 0)
    def _first():
        acc_ref[...] = partial_out          # no broadcast-init pass

    @pl.when(k > 0)
    def _accumulate():
        acc_ref[...] += partial_out

    @pl.when(k == pl.num_programs(1) - 1)
    def _finalize():
        # b2 is added exactly once, at finalize.
        o_ref[...] = (acc_ref[...] + b2_ref[...]).astype(o_ref.dtype)


class MLPParams(NamedTuple):
    w1: jax.Array   # (hidden, ffp)  mxu dtype
    b1: jax.Array   # (1, ffp)       f32
    w2: jax.Array   # (ffp, hidden)  mxu dtype
    b2: jax.Array   # (1, hidden)    f32
    ff: int         # un-padded ff width
    tf: int         # ff tile used for padding / grid


def prepare_params(w1, b1, w2, b2, *, tf=None, mxu_dtype=jnp.bfloat16):
    """Cast + pad the weights ONCE, outside the per-token call path.

    Doing astype/pad per call costs an extra HBM read+write of the full weight
    matrices every invocation (comparable to the kernel's own weight traffic).
    Zero-padding the ff axis is exact: padded W2 rows are zero, so padded ff
    columns contribute nothing to the output regardless of gelu(b1_pad).
    """
    hidden, ff = w1.shape
    assert w2.shape == (ff, hidden) and b1.shape == (ff,) and b2.shape == (hidden,)
    if tf is None:
        tf = _chip_defaults()["tf"]
    tf = min(tf, _round_up(ff, 128))          # lane-aligned ff tile
    ffp = _round_up(ff, tf)

    w1p = w1.astype(mxu_dtype)
    w2p = w2.astype(mxu_dtype)
    b1p = b1.astype(jnp.float32).reshape(1, ff)
    if ffp != ff:
        w1p = jnp.pad(w1p, ((0, 0), (0, ffp - ff)))
        b1p = jnp.pad(b1p, ((0, 0), (0, ffp - ff)))
        w2p = jnp.pad(w2p, ((0, ffp - ff), (0, 0)))
    b2p = b2.astype(jnp.float32).reshape(1, hidden)
    return MLPParams(w1p, b1p, w2p, b2p, ff, tf)


def transformer_mlp(x, params: MLPParams, *, tm=None, approximate_gelu=False,
                    vmem_limit_bytes=None):
    """x: (batch, seq, hidden) -> (batch, seq, hidden).  Eval-mode forward."""
    batch, seq, hidden = x.shape
    w1p, b1p, w2p, b2p, ff, tf = params
    ffp = w1p.shape[1]
    assert w1p.shape[0] == hidden and w2p.shape == (ffp, hidden)

    defaults = _chip_defaults()
    if tm is None:
        tm = defaults["tm"]
    tm_align = defaults["tm_align"]

    M = batch * seq
    # Round small M up to a full MXU-friendly row tile (256, or 128 on v5e),
    # not 8: avoids fragmented MXU passes / awkward bf16 sublane packing.
    tm = min(tm, _round_up(M, tm_align))
    Mp = _round_up(M, tm)

    mxu_dtype = w1p.dtype
    out_dtype = x.dtype
    x2 = x.reshape(M, hidden).astype(mxu_dtype)
    if Mp != M:
        # Padded rows compute gelu(b1) @ W2 garbage that is sliced off below;
        # the work on them is wasted but the visible result is exact.
        x2 = jnp.pad(x2, ((0, Mp - M), (0, 0)))

    grid = (Mp // tm, ffp // tf)
    n_row_tiles = Mp // tm

    in_isz = jnp.dtype(mxu_dtype).itemsize
    out_isz = jnp.dtype(out_dtype).itemsize
    if vmem_limit_bytes is None:
        vmem_limit_bytes = _vmem_limit_bytes(tm, tf, hidden, in_isz, out_isz,
                                             defaults["vmem_cap"])

    # W1/W2 (and biases) are re-streamed once per row tile.
    cost = pl.CostEstimate(
        flops=4 * M * hidden * ff,                  # two matmuls
        transcendentals=M * ff,                     # one tanh/erf per activation
        bytes_accessed=int(Mp * hidden * (in_isz + out_isz)
                           + n_row_tiles * 2 * ffp * hidden * in_isz
                           + n_row_tiles * (ffp + hidden) * 4),
    )

    kernel = functools.partial(mlp_kernel, approximate_gelu=approximate_gelu)

    out = pl.pallas_call(
        kernel,
        out_shape=jax.ShapeDtypeStruct((Mp, hidden), out_dtype),
        grid_spec=pltpu.PrefetchScalarGridSpec(
            num_scalar_prefetch=0,
            grid=grid,
            in_specs=[
                pl.BlockSpec((tm, hidden), lambda i, k: (i, 0)),   # x row tile
                pl.BlockSpec((hidden, tf), lambda i, k: (0, k)),   # W1 ff tile
                pl.BlockSpec((1, tf),      lambda i, k: (0, k)),   # b1 ff tile
                pl.BlockSpec((tf, hidden), lambda i, k: (k, 0)),   # W2 ff tile
                pl.BlockSpec((1, hidden),  lambda i, k: (0, 0)),   # b2 (finalize only)
            ],
            out_specs=pl.BlockSpec((tm, hidden), lambda i, k: (i, 0)),
            scratch_shapes=[pltpu.VMEM((tm, hidden), jnp.float32)],
        ),
        compiler_params=pltpu.CompilerParams(
            # Row-tile axis shards across TensorCores (v7x megacore); the ff axis
            # carries the resident accumulator so it must stay "arbitrary".
            dimension_semantics=("parallel", "arbitrary"),
            vmem_limit_bytes=int(vmem_limit_bytes),
        ),
        cost_estimate=cost,
    )(x2, w1p, b1p, w2p, b2p)

    if Mp != M:
        out = out[:M]
    return out.reshape(batch, seq, hidden)


def _reference(x2d, w1, b1, w2, b2, *, approximate_gelu):
    h = jnp.dot(x2d, w1) + b1
    h = jax.nn.gelu(h, approximate=approximate_gelu)
    return jnp.dot(h, w2) + b2


if __name__ == "__main__":
    batch, seq, hidden_dim, ff_dim = 2, 8, 32, 64

    key = jax.random.PRNGKey(0)
    k_x, k_w1, k_b1, k_w2, k_b2 = jax.random.split(key, 5)

    x = jax.random.normal(k_x, (batch, seq, hidden_dim), dtype=jnp.float32)

    # Deterministic nn.Linear-style init: U(-1/sqrt(fan_in), 1/sqrt(fan_in)),
    # stored as (in, out) so the kernel multiplies without transposition.
    lim1 = 1.0 / math.sqrt(hidden_dim)
    lim2 = 1.0 / math.sqrt(ff_dim)
    w1 = jax.random.uniform(k_w1, (hidden_dim, ff_dim), jnp.float32, -lim1, lim1)
    b1 = jax.random.uniform(k_b1, (ff_dim,), jnp.float32, -lim1, lim1)
    w2 = jax.random.uniform(k_w2, (ff_dim, hidden_dim), jnp.float32, -lim2, lim2)
    b2 = jax.random.uniform(k_b2, (hidden_dim,), jnp.float32, -lim2, lim2)

    # Weights prepared ONCE (cast + pad hoisted out of the per-call path).
    params_bf16 = prepare_params(w1, b1, w2, b2, mxu_dtype=jnp.bfloat16)
    params_f32 = prepare_params(w1, b1, w2, b2, mxu_dtype=jnp.float32)

    x2d = x.reshape(-1, hidden_dim)

    # 1) Default path: bf16 MXU inputs + exact-erf GELU (torch F.gelu default).
    y = jax.block_until_ready(transformer_mlp(x, params_bf16))
    y_ref_erf = _reference(x2d, w1, b1, w2, b2,
                           approximate_gelu=False).reshape(x.shape)
    assert y.shape == (batch, seq, hidden_dim)
    assert jnp.allclose(y, y_ref_erf, atol=3e-2, rtol=3e-2), \
        "bf16/erf path mismatch vs reference"

    # 2) Exact-parity path: f32 MXU inputs + erf GELU.
    y_exact = jax.block_until_ready(transformer_mlp(x, params_f32))
    assert jnp.allclose(y_exact, y_ref_erf, atol=1e-5, rtol=1e-5), \
        "f32/erf path mismatch vs reference"

    # 3) Cheaper tanh-approximate GELU (EUP) with bf16 MXU inputs.
    y_tanh = jax.block_until_ready(
        transformer_mlp(x, params_bf16, approximate_gelu=True))
    y_ref_tanh = _reference(x2d, w1, b1, w2, b2,
                            approximate_gelu=True).reshape(x.shape)
    assert jnp.allclose(y_tanh, y_ref_tanh, atol=3e-2, rtol=3e-2), \
        "bf16/tanh path mismatch vs reference"

    # 4) Ragged-row path (M not a multiple of the row tile).
    x_odd = jax.random.normal(k_x, (3, 5, hidden_dim), dtype=jnp.float32)
    y_odd = jax.block_until_ready(transformer_mlp(x_odd, params_bf16))
    y_odd_ref = _reference(x_odd.reshape(-1, hidden_dim), w1, b1, w2, b2,
                           approximate_gelu=False).reshape(x_odd.shape)
    assert jnp.allclose(y_odd, y_odd_ref, atol=3e-2, rtol=3e-2), \
        "padded-row path mismatch vs reference"

    print("KERNEL_OK")
</pallas_src>

<mosaic_0001>
module attributes {stable_mosaic.version = 11 : i64} {
  func.func @mlp_kernel(%arg0: i32, %arg1: i32, %arg2: memref<256x32xbf16, #tpu.memory_space<vmem>>, %arg3: memref<32x128xbf16, #tpu.memory_space<vmem>>, %arg4: memref<1x128xf32, #tpu.memory_space<vmem>>, %arg5: memref<128x32xbf16, #tpu.memory_space<vmem>>, %arg6: memref<1x32xf32, #tpu.memory_space<vmem>>, %arg7: memref<256x32xf32, #tpu.memory_space<vmem>>, %arg8: memref<256x32xf32, #tpu.memory_space<vmem>>) attributes {dimension_semantics = [#tpu.dimension_semantics<parallel>, #tpu.dimension_semantics<arbitrary>], iteration_bounds = array<i64: 1, 1>, scalar_prefetch = 0 : i64, scratch_operands = 1 : i64, tpu.core_type = #tpu.core_type<tc>, window_params = [{transform_indices = @transform_0, window_bounds = array<i64: 256, 32>}, {transform_indices = @transform_1, window_bounds = array<i64: 32, 128>}, {transform_indices = @transform_2, window_bounds = array<i64: 1, 128>}, {transform_indices = @transform_3, window_bounds = array<i64: 128, 32>}, {pipeline_mode = #tpu.pipeline_mode<synchronous>, transform_indices = @transform_4, window_bounds = array<i64: 1, 32>}, {transform_indices = @transform_5, window_bounds = array<i64: 256, 32>}]} {
    %c0 = arith.constant 0 : index
    %c0_0 = arith.constant 0 : index
    %0 = vector.load %arg2[%c0, %c0_0] : memref<256x32xbf16, #tpu.memory_space<vmem>>, vector<256x32xbf16>
    %c0_1 = arith.constant 0 : index
    %c0_2 = arith.constant 0 : index
    %1 = vector.load %arg3[%c0_1, %c0_2] : memref<32x128xbf16, #tpu.memory_space<vmem>>, vector<32x128xbf16>
    %cst = arith.constant dense<0.000000e+00> : vector<256x128xf32>
    %2 = tpu.matmul %0, %1, %cst {dimension_numbers = #tpu.dot_dimension_numbers<[1], [0], [0], [1], [0, 0, 1, 1], [], []>} : vector<256x32xbf16>, vector<32x128xbf16>, vector<256x128xf32> -> vector<256x128xf32>
    %c0_3 = arith.constant 0 : index
    %c0_4 = arith.constant 0 : index
    %3 = vector.load %arg4[%c0_3, %c0_4] : memref<1x128xf32, #tpu.memory_space<vmem>>, vector<1x128xf32>
    %4 = vector.broadcast %3 : vector<1x128xf32> to vector<256x128xf32>
    %5 = arith.addf %2, %4 : vector<256x128xf32>
    %cst_5 = arith.constant 5.000000e-01 : f32
    %6 = vector.broadcast %cst_5 : f32 to vector<256x128xf32>
    %7 = arith.mulf %6, %5 : vector<256x128xf32>
    %cst_6 = arith.constant 0.707106769 : f32
    %8 = vector.broadcast %cst_6 : f32 to vector<256x128xf32>
    %9 = arith.mulf %5, %8 : vector<256x128xf32>
    %10 = math.erf %9 : vector<256x128xf32>
    %cst_7 = arith.constant 1.000000e+00 : f32
    %11 = vector.broadcast %cst_7 : f32 to vector<256x128xf32>
    %12 = arith.addf %11, %10 : vector<256x128xf32>
    %13 = arith.mulf %7, %12 : vector<256x128xf32>
    %14 = arith.truncf %13 : vector<256x128xf32> to vector<256x128xbf16>
    %c0_8 = arith.constant 0 : index
    %c0_9 = arith.constant 0 : index
    %15 = vector.load %arg5[%c0_8, %c0_9] : memref<128x32xbf16, #tpu.memory_space<vmem>>, vector<128x32xbf16>
    %cst_10 = arith.constant dense<0.000000e+00> : vector<256x32xf32>
    %16 = tpu.matmul %14, %15, %cst_10 {dimension_numbers = #tpu.dot_dimension_numbers<[1], [0], [0], [1], [0, 0, 1, 1], [], []>} : vector<256x128xbf16>, vector<128x32xbf16>, vector<256x32xf32> -> vector<256x32xf32>
    %c0_i32 = arith.constant 0 : i32
    %17 = arith.cmpi eq, %arg1, %c0_i32 : i32
    %18 = arith.extui %17 : i1 to i32
    %c0_i32_11 = arith.constant 0 : i32
    %19 = arith.cmpi ne, %18, %c0_i32_11 : i32
    scf.if %19 {
      %c0_16 = arith.constant 0 : index
      %c0_17 = arith.constant 0 : index
      %26 = vector.load %arg8[%c0_16, %c0_17] : memref<256x32xf32, #tpu.memory_space<vmem>>, vector<256x32xf32>
      tpu.vector_store %arg8[%c0_16, %c0_17], %16 {strides = array<i32>} : memref<256x32xf32, #tpu.memory_space<vmem>>, vector<256x32xf32>,
    } else {
    }
    %c0_i32_12 = arith.constant 0 : i32
    %20 = arith.cmpi sgt, %arg1, %c0_i32_12 : i32
    %21 = arith.extui %20 : i1 to i32
    %c0_i32_13 = arith.constant 0 : i32
    %22 = arith.cmpi ne, %21, %c0_i32_13 : i32
    scf.if %22 {
      %c0_16 = arith.constant 0 : index
      %c0_17 = arith.constant 0 : index
      %26 = vector.load %arg8[%c0_16, %c0_17] : memref<256x32xf32, #tpu.memory_space<vmem>>, vector<256x32xf32>
      %27 = arith.addf %26, %16 : vector<256x32xf32>
      %c0_18 = arith.constant 0 : index
      %c0_19 = arith.constant 0 : index
      %28 = vector.load %arg8[%c0_18, %c0_19] : memref<256x32xf32, #tpu.memory_space<vmem>>, vector<256x32xf32>
      tpu.vector_store %arg8[%c0_18, %c0_19], %27 {strides = array<i32>} : memref<256x32xf32, #tpu.memory_space<vmem>>, vector<256x32xf32>,
    } else {
    }
    %c0_i32_14 = arith.constant 0 : i32
    %23 = arith.cmpi eq, %arg1, %c0_i32_14 : i32
    %24 = arith.extui %23 : i1 to i32
    %c0_i32_15 = arith.constant 0 : i32
    %25 = arith.cmpi ne, %24, %c0_i32_15 : i32
    scf.if %25 {
      %c0_16 = arith.constant 0 : index
      %c0_17 = arith.constant 0 : index
      %26 = vector.load %arg8[%c0_16, %c0_17] : memref<256x32xf32, #tpu.memory_space<vmem>>, vector<256x32xf32>
      %c0_18 = arith.constant 0 : index
      %c0_19 = arith.constant 0 : index
      %27 = vector.load %arg6[%c0_18, %c0_19] : memref<1x32xf32, #tpu.memory_space<vmem>>, vector<1x32xf32>
      %28 = vector.broadcast %27 : vector<1x32xf32> to vector<256x32xf32>
      %29 = arith.addf %26, %28 : vector<256x32xf32>
      %c0_20 = arith.constant 0 : index
      %c0_21 = arith.constant 0 : index
      %30 = vector.load %arg7[%c0_20, %c0_21] : memref<256x32xf32, #tpu.memory_space<vmem>>, vector<256x32xf32>
      tpu.vector_store %arg7[%c0_20, %c0_21], %29 {strides = array<i32>} : memref<256x32xf32, #tpu.memory_space<vmem>>, vector<256x32xf32>,
    } else {
    }
    return
  }
  func.func @transform_0(%arg0: i32, %arg1: i32) -> (i32, i32) {
    %c0_i32 = arith.constant 0 : i32
    %c0_i32_0 = arith.constant 0 : i32
    return %arg0, %c0_i32 : i32, i32
  }
  func.func @transform_1(%arg0: i32, %arg1: i32) -> (i32, i32) {
    %c0_i32 = arith.constant 0 : i32
    %c0_i32_0 = arith.constant 0 : i32
    return %c0_i32, %arg1 : i32, i32
  }
  func.func @transform_2(%arg0: i32, %arg1: i32) -> (i32, i32) {
    %c0_i32 = arith.constant 0 : i32
    %c0_i32_0 = arith.constant 0 : i32
    return %c0_i32, %arg1 : i32, i32
  }
  func.func @transform_3(%arg0: i32, %arg1: i32) -> (i32, i32) {
    %c0_i32 = arith.constant 0 : i32
    %c0_i32_0 = arith.constant 0 : i32
    return %arg1, %c0_i32 : i32, i32
  }
  func.func @transform_4(%arg0: i32, %arg1: i32) -> (i32, i32) {
    %c0_i32 = arith.constant 0 : i32
    %c0_i32_0 = arith.constant 0 : i32
    %c0_i32_1 = arith.constant 0 : i32
    return %c0_i32, %c0_i32_0 : i32, i32
  }
  func.func @transform_5(%arg0: i32, %arg1: i32) -> (i32, i32) {
    %c0_i32 = arith.constant 0 : i32
    %c0_i32_0 = arith.constant 0 : i32
    return %arg0, %c0_i32 : i32, i32
  }
}

</mosaic_0001>

<bundles_post_ra>
// kernel: tpu_custom_call.1
= control target key start
LH: loop header
LB: loop body
LE: loop exit
PB: predicated region body
PF: predicated region fallthrough
CT: control target
= control target key end

     0   :  { %vm156_vm0 = vcmask 261120   ;;  %s1707_s1 = inlined_call_operand.vmem [shape: bf16[32,128], index: 1, kind: input, shape index: {}]   ;;  %s1708_s0 = inlined_call_operand.vmem [shape: bf16[256,32], index: 0, kind: input, shape index: {}]   ;;  %s1709_s3 = inlined_call_operand.vmem [shape: bf16[128,32], index: 3, kind: input, shape index: {}]   ;;  %s1710_s2 = inlined_call_operand.vmem [shape: f32[1,128], index: 2, kind: input, shape index: {}]   ;;  %s1711_s4 = inlined_call_operand.vmem [shape: f32[1,32], index: 4, kind: input, shape index: {}]   ;;  %s1712_s5 = inlined_call_operand.vmem [shape: f32[256,32], index: 5, kind: output, shape index: {}]  }
   0x1   :  { %v1199_v0 = vld [vmem:[%s1707_s1] sm:$0xff]   ;;  %v1200_v1 = vld [vmem:[%s1707_s1 + $0x8] sm:$0xff]   ;;  %v1203_v4 = vld [vmem:[%s1708_s0 + $0x10] sm:$0xff]  }
   0x2   :  { %1099 = vmatprep.subr.bf16.mxu0 %v1199_v0  ;;  %v1201_v2 = vld [vmem:[%s1708_s0] sm:$0xff]   ;;  %v1202_v3 = vld [vmem:[%s1708_s0 + $0x8] sm:$0xff]   ;;  %v1204_v5 = vld [vmem:[%s1708_s0 + $0x18] sm:$0xff]  }
   0x3   :  { %1100 = vmatpush3.bf16.msra.mxu0 %v1199_v0  ;;  %1103 = vmatprep.mubr.msk.bf16.mxu0 %vm156_vm0, %v1201_v2  ;;  %v1205_v6 = vld [vmem:[%s1708_s0 + $0x20] sm:$0xff]   ;;  %v1218_v8 = vld [vmem:[%s1709_s3 + $0x8] sm:$0xff]   ;;  %v1207_v10 = vld [vmem:[%s1708_s0 + $0x30] sm:$0xff]  }
   0x4   :  { %1101 = vmatprep.subr.bf16.mxu0 %v1200_v1  ;;  %v1217_v7 = vld [vmem:[%s1709_s3] sm:$0xff]   ;;  %v1206_v9 = vld [vmem:[%s1708_s0 + $0x28] sm:$0xff]   ;;  %v1208_v11 = vld [vmem:[%s1708_s0 + $0x38] sm:$0xff]  }
   0x5   :  { %1183 = vmatprep.subr.bf16.mxu1 %v1217_v7  ;;  %v1209_v12 = vld [vmem:[%s1708_s0 + $0x40] sm:$0xff]   ;;  %v1210_v13 = vld [vmem:[%s1708_s0 + $0x48] sm:$0xff]   ;;  %v1211_v14 = vld [vmem:[%s1708_s0 + $0x50] sm:$0xff]  }
   0x6   :  { %1191 = vmatpush3.bf16.msra.mxu1 %v1217_v7  ;;  %v1212_v15 = vld [vmem:[%s1708_s0 + $0x58] sm:$0xff]   ;;  %v1213_v16 = vld [vmem:[%s1708_s0 + $0x60] sm:$0xff]   ;;  %v1214_v17 = vld [vmem:[%s1708_s0 + $0x68] sm:$0xff]  }
   0x7   :  { %1102 = vmatpush3.bf16.msra.mxu0 %v1200_v1  ;;  %1184 = vmatprep.subr.bf16.mxu1 %v1218_v8  ;;  %v1215_v18 = vld [vmem:[%s1708_s0 + $0x70] sm:$0xff]   ;;  %v1216_v19 = vld [vmem:[%s1708_s0 + $0x78] sm:$0xff]   ;;  %v1221_v22 = vld [vmem:[%s1709_s3 + $0x20] sm:$0xff]  }
   0x8   :  { %1135 = vmatprep.subr.bf16.mxu0 %v1217_v7  ;;  %v1219_v20 = vld [vmem:[%s1709_s3 + $0x10] sm:$0xff]   ;;  %v1220_v21 = vld [vmem:[%s1709_s3 + $0x18] sm:$0xff]   ;;  %v1222_v23 = vld [vmem:[%s1709_s3 + $0x28] sm:$0xff]  }
   0x9   :  { %v1223_v24 = vld [vmem:[%s1709_s3 + $0x30] sm:$0xff]   ;;  %v1224_v25 = vld [vmem:[%s1709_s3 + $0x38] sm:$0xff]   ;;  %v1416_v26 = vld [vmem:[%s1710_s2] ss:$0 sm:$0xff] }
   0xa   :  { %1104 = vmatmul.mubr.msk.bf16.vlgmr.msra.gmra.mrb[0].mxu0 %vm156_vm0, %v1202_v3  ;;  %1192 = vmatpush3.bf16.msra.mxu1 %v1218_v8 }
   0xb   :  { %1107 = vmatprep.mubr.msk.bf16.mxu0 %vm156_vm0, %v1203_v4  ;;  %1136 = vmatpush3.bf16.msra.mxu0 %v1217_v7 }
   0xc   :  { %1137 = vmatprep.subr.bf16.mxu0 %v1218_v8  ;;  %1185 = vmatprep.subr.bf16.mxu1 %v1219_v20 }
   0xe   :  { %1193 = vmatpush3.bf16.msra.mxu1 %v1219_v20 }
   0xf   :  { %1138 = vmatpush3.bf16.msra.mxu0 %v1218_v8  ;;  %1186 = vmatprep.subr.bf16.mxu1 %v1220_v21 }
  0x10   :  { %1139 = vmatprep.subr.bf16.mxu0 %v1219_v20 }
  0x12   :  { %1108 = vmatmul.mubr.msk.bf16.gmra.mrb[4].mxu0 %vm156_vm0, %v1204_v5  ;;  %1194 = vmatpush3.bf16.msra.mxu1 %v1220_v21 }
  0x13   :  { %1111 = vmatprep.mubr.msk.bf16.mxu0 %vm156_vm0, %v1205_v6  ;;  %1140 = vmatpush3.bf16.msra.mxu0 %v1219_v20 }
  0x14   :  { %1141 = vmatprep.subr.bf16.mxu0 %v1220_v21  ;;  %1187 = vmatprep.subr.bf16.mxu1 %v1221_v22 }
  0x16   :  { %1195 = vmatpush3.bf16.msra.mxu1 %v1221_v22 }
  0x17   :  { %1142 = vmatpush3.bf16.msra.mxu0 %v1220_v21  ;;  %1188 = vmatprep.subr.bf16.mxu1 %v1222_v23 }
  0x18   :  { %1143 = vmatprep.subr.bf16.mxu0 %v1221_v22 }
  0x1a   :  { %1112 = vmatmul.mubr.msk.bf16.gmra.mrb[8].mxu0 %vm156_vm0, %v1206_v9  ;;  %1196 = vmatpush3.bf16.msra.mxu1 %v1222_v23 }
  0x1b   :  { %1115 = vmatprep.mubr.msk.bf16.mxu0 %vm156_vm0, %v1207_v10  ;;  %1144 = vmatpush3.bf16.msra.mxu0 %v1221_v22 }
  0x1c   :  { %1145 = vmatprep.subr.bf16.mxu0 %v1222_v23  ;;  %1189 = vmatprep.subr.bf16.mxu1 %v1223_v24 }
  0x1e   :  { %1197 = vmatpush3.bf16.msra.mxu1 %v1223_v24 }
  0x1f   :  { %1146 = vmatpush3.bf16.msra.mxu0 %v1222_v23  ;;  %1190 = vmatprep.subr.bf16.mxu1 %v1224_v25 }
  0x20   :  { %1147 = vmatprep.subr.bf16.mxu0 %v1223_v24 }
  0x22   :  { %1116 = vmatmul.mubr.msk.bf16.gmra.mrb[12].mxu0 %vm156_vm0, %v1208_v11  ;;  %1198 = vmatpush3.bf16.msra.mxu1 %v1224_v25 }
  0x23   :  { %1119 = vmatprep.mubr.msk.bf16.mxu0 %vm156_vm0, %v1209_v12  ;;  %1148 = vmatpush3.bf16.msra.mxu0 %v1223_v24 }
  0x24   :  { %1149 = vmatprep.subr.bf16.mxu0 %v1224_v25 }
  0x27   :  { %1150 = vmatpush3.bf16.msra.mxu0 %v1224_v25 }
  0x2a   :  { %1120 = vmatmul.mubr.msk.bf16.gmra.mrb[16].mxu0 %vm156_vm0, %v1210_v13 }
  0x2b   :  { %1123 = vmatprep.mubr.msk.bf16.mxu0 %vm156_vm0, %v1211_v14 }
  0x32   :  { %1124 = vmatmul.mubr.msk.bf16.gmra.mrb[20].mxu0 %vm156_vm0, %v1212_v15 }
  0x33   :  { %1127 = vmatprep.mubr.msk.bf16.mxu0 %vm156_vm0, %v1213_v16 }
  0x3a   :  { %1128 = vmatmul.mubr.msk.bf16.gmra.mrb[24].mxu0 %vm156_vm0, %v1214_v17 }
  0x3b   :  { %1131 = vmatprep.mubr.msk.bf16.mxu0 %vm156_vm0, %v1215_v18 }
  0x42   :  { %1132 = vmatmul.mubr.msk.bf16.gmra.mrb[28].mxu0 %vm156_vm0, %v1216_v19 }
  0xdd   :  { %v1105_v27 = vpop.f32.mrb[0].mxu0 }
  0xde   :  { %v248_v28 = vadd.f32 %v1105_v27, %v1416_v26  ;;  %v239_v29 = vpop.f32.mrb[1].mxu0 }
  0xdf   :  { %v240_v30 = vadd.f32 %v1416_v26, %v239_v29  ;;  %v1106_v31 = vpop.f32.mrb[2].mxu0 }
  0xe0   :  { %v400_v32 = vmul.f32 0.70710677, %v248_v28  ;;  %v251_v33 = vadd.f32 %v1106_v31, %v1416_v26  ;;  %v242_v34 = vpop.f32.mrb[3].mxu0  ;;  %v368_v60 = vmul.f32 0.5, %v248_v28 }
  0xe1   :  { %v398_v35 = vmul.f32 0.70710677, %v240_v30  ;;  %v243_v36 = vadd.f32 %v1416_v26, %v242_v34  ;;  %v366_v1 = vmul.f32 0.5, %v240_v30 }
  0xe2   :  { %1225 = verf.f32 %v400_v32  ;;  %v401_v37 = vmul.f32 0.70710677, %v251_v33  ;;  %v369_v61 = vmul.f32 0.5, %v251_v33 }
  0xe3   :  { %1227 = verf.f32 %v398_v35  ;;  %v399_v38 = vmul.f32 0.70710677, %v243_v36  ;;  %v367_v2 = vmul.f32 0.5, %v243_v36 }
  0xe4   :  { %1229 = verf.f32 %v401_v37 }
  0xe5   :  { %1231 = verf.f32 %v399_v38  ;;  %v1109_v39 = vpop.f32.mrb[4].mxu0 }
  0xe6   :  { %v264_v40 = vadd.f32 %v1109_v39, %v1416_v26  ;;  %v255_v41 = vpop.f32.mrb[5].mxu0 }
  0xe7   :  { %v256_v42 = vadd.f32 %v1416_v26, %v255_v41  ;;  %v1110_v43 = vpop.f32.mrb[6].mxu0 }
  0xe8   :  { %v404_v44 = vmul.f32 0.70710677, %v264_v40  ;;  %v267_v45 = vadd.f32 %v1110_v43, %v1416_v26  ;;  %v258_v46 = vpop.f32.mrb[7].mxu0  ;;  %v372_v21 = vmul.f32 0.5, %v264_v40 }
  0xe9   :  { %v402_v47 = vmul.f32 0.70710677, %v256_v42  ;;  %v1426_v48 = vadd.f32 %v1416_v26, %v258_v46  ;;  %v370_v32 = vmul.f32 0.5, %v256_v42 }
  0xea   :  { %1233 = verf.f32 %v404_v44  ;;  %v405_v49 = vmul.f32 0.70710677, %v267_v45  ;;  %v373_v27 = vmul.f32 0.5, %v267_v45 }
  0xeb   :  { %1235 = verf.f32 %v402_v47  ;;  %v403_v50 = vmul.f32 0.70710677, %v1426_v48  ;;  %v371_v38 = vmul.f32 0.5, %v1426_v48 }
  0xec   :  { %v1226_v51 = vpop.eup %1225  ;;  %1237 = verf.f32 %v405_v49 }
  0xed   :  { %v1228_v52 = vpop.eup %1227  ;;  %v464_v53 = vadd.f32 1.0, %v1226_v51  ;;  %1239 = verf.f32 %v403_v50  ;;  %v1113_v54 = vpop.f32.mrb[8].mxu0 }
  0xee   :  { %v1230_v55 = vpop.eup %1229  ;;  %v462_v56 = vadd.f32 1.0, %v1228_v52  ;;  %v1430_v57 = vadd.f32 %v1113_v54, %v1416_v26  ;;  %v271_v58 = vpop.f32.mrb[9].mxu0 }
  0xef   :  { %v1232_v59 = vpop.eup %1231  ;;  %v465_v62 = vadd.f32 1.0, %v1230_v55  ;;  %v1433_v63 = vadd.f32 %v1416_v26, %v271_v58  ;;  %v1114_v0 = vpop.f32.mrb[10].mxu0  ;;  %v496_v6 = vmul.f32 %v464_v53, %v368_v60 }
  0xf0   :  { %v463_v3 = vadd.f32 1.0, %v1232_v59  ;;  %v408_v4 = vmul.f32 0.70710677, %v1430_v57  ;;  %v274_v5 = vpop.f32.mrb[11].mxu0  ;;  %v283_v9 = vadd.f32 %v1114_v0, %v1416_v26  ;;  %v494_v10 = vmul.f32 %v462_v56, %v366_v1 }
  0xf1   :  { %v497_v7 = vmul.f32 %v465_v62, %v369_v61  ;;  %v406_v8 = vmul.f32 0.70710677, %v1433_v63  ;;  %v275_v12 = vadd.f32 %v1416_v26, %v274_v5  ;;  %v376_v55 = vmul.f32 0.5, %v1430_v57 }
  0xf2   :  { %v495_v11 = vmul.f32 %v463_v3, %v367_v2  ;;  %1241 = verf.f32 %v408_v4  ;;  %v409_v14 = vmul.f32 0.70710677, %v283_v9  ;;  %v374_v61 = vmul.f32 0.5, %v1433_v63 }
  0xf3   :  { %v527_v13 = vpack.c.bf16 %v497_v7, %v496_v6  ;;  %1243 = verf.f32 %v406_v8  ;;  %v407_v16 = vmul.f32 0.70710677, %v275_v12  ;;  %v377_v62 = vmul.f32 0.5, %v283_v9 }
  0xf4   :  { %v1234_v15 = vpop.eup %1233  ;;  %v526_v17 = vpack.c.bf16 %v495_v11, %v494_v10  ;;  %1245 = verf.f32 %v409_v14  ;;  %v375_v3 = vmul.f32 0.5, %v275_v12 }
  0xf5   :  { %v1236_v18 = vpop.eup %1235  ;;  %v1117_v19 = vpop.f32.mrb[12].mxu0  ;;  %v468_v22 = vadd.f32 1.0, %v1234_v15  ;;  %1247 = verf.f32 %v407_v16 }
  0xf6   :  { %v1238_v20 = vpop.eup %1237  ;;  %v1440_v23 = vadd.f32 %v1117_v19, %v1416_v26  ;;  %v287_v24 = vpop.f32.mrb[13].mxu0  ;;  %1151 = vmatprep.mubr.bf16.mxu0 %v526_v17  ;;  %v466_v31 = vadd.f32 1.0, %v1236_v18 }
  0xf7   :  { %v1240_v25 = vpop.eup %1239  ;;  %v469_v28 = vadd.f32 1.0, %v1238_v20  ;;  %v1443_v29 = vadd.f32 %v1416_v26, %v287_v24  ;;  %v1118_v30 = vpop.f32.mrb[14].mxu0  ;;  %1152 = vmatmul.mubr.bf16.vlgmr.msra.gmra.mrb[32].mxu0 %v527_v13  ;;  %v500_v41 = vmul.f32 %v468_v22, %v372_v21 }
  0xf8   :  { %v412_v33 = vmul.f32 0.70710677, %v1440_v23  ;;  %v1447_v34 = vadd.f32 %v1118_v30, %v1416_v26  ;;  %v290_v35 = vpop.f32.mrb[15].mxu0  ;;  %v467_v36 = vadd.f32 1.0, %v1240_v25  ;;  %v498_v44 = vmul.f32 %v466_v31, %v370_v32 }
  0xf9   :  { %v501_v37 = vmul.f32 %v469_v28, %v373_v27  ;;  %v410_v39 = vmul.f32 0.70710677, %v1443_v29  ;;  %v1452_v40 = vadd.f32 %v1416_v26, %v290_v35  ;;  %v380_v24 = vmul.f32 0.5, %v1440_v23 }
  0xfa   :  { %1249 = verf.f32 %v412_v33  ;;  %v413_v43 = vmul.f32 0.70710677, %v1447_v34  ;;  %v499_v45 = vmul.f32 %v467_v36, %v371_v38  ;;  %v381_v25 = vmul.f32 0.5, %v1447_v34 }
  0xfb   :  { %1251 = verf.f32 %v410_v39  ;;  %v411_v42 = vmul.f32 0.70710677, %v1452_v40  ;;  %v529_v47 = vpack.c.bf16 %v501_v37, %v500_v41  ;;  %v378_v31 = vmul.f32 0.5, %v1443_v29 }
  0xfc   :  { %v1242_v46 = vpop.eup %1241  ;;  %1253 = verf.f32 %v413_v43  ;;  %v528_v50 = vpack.c.bf16 %v499_v45, %v498_v44  ;;  %v379_v32 = vmul.f32 0.5, %v1452_v40 }
  0xfd   :  { %v1244_v49 = vpop.eup %1243  ;;  %1255 = verf.f32 %v411_v42  ;;  %v1121_v48 = vpop.f32.mrb[16].mxu0  ;;  %v472_v51 = vadd.f32 1.0, %v1242_v46 }
  0xfe   :  { %v1457_v52 = vadd.f32 %v1121_v48, %v1416_v26  ;;  %v303_v53 = vpop.f32.mrb[17].mxu0  ;;  %v1246_v54 = vpop.eup %1245  ;;  %v470_v56 = vadd.f32 1.0, %v1244_v49  ;;  %1155 = vmatprep.mubr.bf16.mxu1 %v528_v50 }
  0xff   :  { %v1461_v58 = vadd.f32 %v1416_v26, %v303_v53  ;;  %v1122_v59 = vpop.f32.mrb[18].mxu0  ;;  %v1248_v60 = vpop.eup %1247  ;;  %v473_v0 = vadd.f32 1.0, %v1246_v54  ;;  %1156 = vmatmul.mubr.bf16.vlgmr.msra.gmra.mrb[0].mxu1 %v529_v47  ;;  %v504_v6 = vmul.f32 %v472_v51, %v376_v55 }
 0x100   :  { %v416_v1 = vmul.f32 0.70710677, %v1457_v52  ;;  %v306_v2 = vpop.f32.mrb[19].mxu0  ;;  %v471_v4 = vadd.f32 1.0, %v1248_v60  ;;  %v1467_v57 = vadd.f32 %v1122_v59, %v1416_v26  ;;  %v502_v63 = vmul.f32 %v470_v56, %v374_v61 }
 0x101   :  { %v414_v5 = vmul.f32 0.70710677, %v1461_v58  ;;  %v505_v7 = vmul.f32 %v473_v0, %v377_v62  ;;  %v1470_v8 = vadd.f32 %v1416_v26, %v306_v2  ;;  %v384_v53 = vmul.f32 0.5, %v1457_v52 }
 0x102   :  { %1257 = verf.f32 %v416_v1  ;;  %v503_v9 = vmul.f32 %v471_v4, %v375_v3  ;;  %v417_v10 = vmul.f32 0.70710677, %v1467_v57  ;;  %v382_v60 = vmul.f32 0.5, %v1461_v58 }
 0x103   :  { %1259 = verf.f32 %v414_v5  ;;  %v415_v12 = vmul.f32 0.70710677, %v1470_v8  ;;  %v531_v13 = vpack.c.bf16 %v505_v7, %v504_v6  ;;  %v385_v61 = vmul.f32 0.5, %v1467_v57 }
 0x104   :  { %v1250_v11 = vpop.eup %1249  ;;  %1261 = verf.f32 %v417_v10  ;;  %v530_v17 = vpack.c.bf16 %v503_v9, %v502_v63  ;;  %v383_v2 = vmul.f32 0.5, %v1470_v8 }
 0x105   :  { %v1252_v14 = vpop.eup %1251  ;;  %v476_v15 = vadd.f32 1.0, %v1250_v11  ;;  %v1125_v16 = vpop.f32.mrb[20].mxu0  ;;  %1263 = verf.f32 %v415_v12 }
 0x106   :  { %v1254_v18 = vpop.eup %1253  ;;  %v474_v19 = vadd.f32 1.0, %v1252_v14  ;;  %v1475_v20 = vadd.f32 %v1125_v16, %v1416_v26  ;;  %v319_v21 = vpop.f32.mrb[21].mxu0  ;;  %1159 = vmatprep.mubr.bf16.mxu1 %v530_v17 }
 0x107   :  { %v1256_v22 = vpop.eup %1255  ;;  %v477_v27 = vadd.f32 1.0, %v1254_v18  ;;  %v1480_v28 = vadd.f32 %v1416_v26, %v319_v21  ;;  %v1126_v30 = vpop.f32.mrb[22].mxu0  ;;  %1160 = vmatmul.mubr.bf16.gmra.mrb[4].mxu1 %v531_v13  ;;  %v508_v37 = vmul.f32 %v476_v15, %v380_v24 }
 0x108   :  { %v475_v33 = vadd.f32 1.0, %v1256_v22  ;;  %v420_v35 = vmul.f32 0.70710677, %v1475_v20  ;;  %v322_v36 = vpop.f32.mrb[23].mxu0  ;;  %v331_v34 = vadd.f32 %v1126_v30, %v1416_v26  ;;  %v506_v39 = vmul.f32 %v474_v19, %v378_v31 }
 0x109   :  { %v509_v38 = vmul.f32 %v477_v27, %v381_v25  ;;  %v418_v23 = vmul.f32 0.70710677, %v1480_v28  ;;  %v323_v43 = vadd.f32 %v1416_v26, %v322_v36  ;;  %v388_v18 = vmul.f32 0.5, %v1475_v20 }
 0x10a   :  { %v507_v41 = vmul.f32 %v475_v33, %v379_v32  ;;  %1265 = verf.f32 %v420_v35  ;;  %v421_v29 = vmul.f32 0.70710677, %v331_v34  ;;  %v386_v25 = vmul.f32 0.5, %v1480_v28 }
 0x10b   :  { %1267 = verf.f32 %v418_v23  ;;  %v533_v42 = vpack.c.bf16 %v509_v38, %v508_v37  ;;  %v419_v44 = vmul.f32 0.70710677, %v323_v43  ;;  %v389_v27 = vmul.f32 0.5, %v331_v34 }
 0x10c   :  { %v1258_v40 = vpop.eup %1257  ;;  %v532_v45 = vpack.c.bf16 %v507_v41, %v506_v39  ;;  %1269 = verf.f32 %v421_v29  ;;  %v387_v33 = vmul.f32 0.5, %v323_v43 }
 0x10d   :  { %v1260_v46 = vpop.eup %1259  ;;  %v1129_v47 = vpop.f32.mrb[24].mxu0  ;;  %v480_v49 = vadd.f32 1.0, %v1258_v40  ;;  %1271 = verf.f32 %v419_v44 }
 0x10e   :  { %v1489_v48 = vadd.f32 %v1129_v47, %v1416_v26  ;;  %v335_v50 = vpop.f32.mrb[25].mxu0  ;;  %1163 = vmatprep.mubr.bf16.mxu1 %v532_v45  ;;  %v1262_v51 = vpop.eup %1261  ;;  %v478_v54 = vadd.f32 1.0, %v1260_v46 }
 0x10f   :  { %v1493_v55 = vadd.f32 %v1416_v26, %v335_v50  ;;  %v1130_v56 = vpop.f32.mrb[26].mxu0  ;;  %v1264_v59 = vpop.eup %1263  ;;  %v481_v62 = vadd.f32 1.0, %v1262_v51  ;;  %1164 = vmatmul.mubr.bf16.gmra.mrb[8].mxu1 %v533_v42  ;;  %v512_v5 = vmul.f32 %v480_v49, %v384_v53 }
 0x110   :  { %v424_v0 = vmul.f32 0.70710677, %v1489_v48  ;;  %v338_v1 = vpop.f32.mrb[27].mxu0  ;;  %v479_v3 = vadd.f32 1.0, %v1264_v59  ;;  %v347_v4 = vadd.f32 %v1130_v56, %v1416_v26  ;;  %v510_v58 = vmul.f32 %v478_v54, %v382_v60 }
 0x111   :  { %v422_v52 = vmul.f32 0.70710677, %v1493_v55  ;;  %v513_v6 = vmul.f32 %v481_v62, %v385_v61  ;;  %v339_v7 = vadd.f32 %v1416_v26, %v338_v1  ;;  %v392_v49 = vmul.f32 0.5, %v1489_v48 }
 0x112   :  { %1273 = verf.f32 %v424_v0  ;;  %v511_v63 = vmul.f32 %v479_v3, %v383_v2  ;;  %v425_v57 = vmul.f32 0.70710677, %v347_v4  ;;  %v393_v50 = vmul.f32 0.5, %v347_v4 }
 0x113   :  { %1275 = verf.f32 %v422_v52  ;;  %v423_v10 = vmul.f32 0.70710677, %v339_v7  ;;  %v535_v11 = vpack.c.bf16 %v513_v6, %v512_v5  ;;  %v390_v51 = vmul.f32 0.5, %v1493_v55 }
 0x114   :  { %v1266_v9 = vpop.eup %1265  ;;  %1277 = verf.f32 %v425_v57  ;;  %v534_v13 = vpack.c.bf16 %v511_v63, %v510_v58  ;;  %v391_v53 = vmul.f32 0.5, %v339_v7 }
 0x115   :  { %v1268_v12 = vpop.eup %1267  ;;  %v1133_v8 = vpop.f32.mrb[28].mxu0  ;;  %v484_v14 = vadd.f32 1.0, %v1266_v9  ;;  %1279 = verf.f32 %v423_v10 }
 0x116   :  { %v360_v15 = vadd.f32 %v1133_v8, %v1416_v26  ;;  %v351_v16 = vpop.f32.mrb[29].mxu0  ;;  %v1270_v17 = vpop.eup %1269  ;;  %v482_v19 = vadd.f32 1.0, %v1268_v12  ;;  %1167 = vmatprep.mubr.bf16.mxu1 %v534_v13 }
 0x117   :  { %v352_v21 = vadd.f32 %v1416_v26, %v351_v16  ;;  %v1134_v22 = vpop.f32.mrb[30].mxu0  ;;  %v1272_v24 = vpop.eup %1271  ;;  %v485_v30 = vadd.f32 1.0, %v1270_v17  ;;  %1168 = vmatmul.mubr.bf16.gmra.mrb[12].mxu1 %v535_v11  ;;  %v516_v38 = vmul.f32 %v484_v14, %v388_v18  ;;  %v1517_v17 = vld [vmem:[%s1711_s4] ss:$0 sm:$0xff] }
 0x118   :  { %v428_v31 = vmul.f32 0.70710677, %v360_v15  ;;  %v354_v32 = vpop.f32.mrb[31].mxu0  ;;  %v483_v35 = vadd.f32 1.0, %v1272_v24  ;;  %v363_v37 = vadd.f32 %v1134_v22, %v1416_v26  ;;  %v514_v39 = vmul.f32 %v482_v19, %v386_v25 }
 0x119   :  { %v426_v36 = vmul.f32 0.70710677, %v352_v21  ;;  %v517_v20 = vmul.f32 %v485_v30, %v389_v27  ;;  %v355_v23 = vadd.f32 %v1416_v26, %v354_v32  ;;  %v396_v4 = vmul.f32 0.5, %v360_v15 }
 0x11a   :  { %1281 = verf.f32 %v428_v31  ;;  %v515_v41 = vmul.f32 %v483_v35, %v387_v33  ;;  %v429_v29 = vmul.f32 0.70710677, %v363_v37  ;;  %v397_v6 = vmul.f32 0.5, %v363_v37 }
 0x11b   :  { %1283 = verf.f32 %v426_v36  ;;  %v427_v34 = vmul.f32 0.70710677, %v355_v23  ;;  %v537_v42 = vpack.c.bf16 %v517_v20, %v516_v38  ;;  %v394_v55 = vmul.f32 0.5, %v352_v21 }
 0x11c   :  { %v1274_v28 = vpop.eup %1273  ;;  %1285 = verf.f32 %v429_v29  ;;  %v536_v44 = vpack.c.bf16 %v515_v41, %v514_v39  ;;  %v395_v7 = vmul.f32 0.5, %v355_v23 }
 0x11d   :  { %v1276_v40 = vpop.eup %1275  ;;  %v488_v43 = vadd.f32 1.0, %v1274_v28  ;;  %1287 = verf.f32 %v427_v34 }
 0x11e   :  { %v1278_v45 = vpop.eup %1277  ;;  %v486_v46 = vadd.f32 1.0, %v1276_v40  ;;  %1171 = vmatprep.mubr.bf16.mxu1 %v536_v44 }
 0x11f   :  { %v1280_v47 = vpop.eup %1279  ;;  %v489_v26 = vadd.f32 1.0, %v1278_v45  ;;  %1172 = vmatmul.mubr.bf16.gmra.mrb[16].mxu1 %v537_v42  ;;  %v520_v56 = vmul.f32 %v488_v43, %v392_v49 }
 0x120   :  { %v487_v54 = vadd.f32 1.0, %v1280_v47  ;;  %v518_v60 = vmul.f32 %v486_v46, %v390_v51 }
 0x121   :  { %v521_v59 = vmul.f32 %v489_v26, %v393_v50 }
 0x122   :  { %v519_v61 = vmul.f32 %v487_v54, %v391_v53 }
 0x123   :  { %v539_v0 = vpack.c.bf16 %v521_v59, %v520_v56 }
 0x124   :  { %v1282_v62 = vpop.eup %1281  ;;  %v538_v2 = vpack.c.bf16 %v519_v61, %v518_v60 }
 0x125   :  { %v1284_v1 = vpop.eup %1283  ;;  %v492_v3 = vadd.f32 1.0, %v1282_v62 }
 0x126   :  { %v1286_v52 = vpop.eup %1285  ;;  %v490_v5 = vadd.f32 1.0, %v1284_v1  ;;  %1175 = vmatprep.mubr.bf16.mxu1 %v538_v2 }
 0x127   :  { %v1288_v48 = vpop.eup %1287  ;;  %v493_v58 = vadd.f32 1.0, %v1286_v52  ;;  %1176 = vmatmul.mubr.bf16.gmra.mrb[20].mxu1 %v539_v0  ;;  %v524_v57 = vmul.f32 %v492_v3, %v396_v4 }
 0x128   :  { %v491_v63 = vadd.f32 1.0, %v1288_v48  ;;  %v522_v10 = vmul.f32 %v490_v5, %v394_v55 }
 0x129   :  { %v525_v9 = vmul.f32 %v493_v58, %v397_v6 }
 0x12a   :  { %v523_v11 = vmul.f32 %v491_v63, %v395_v7 }
 0x12b   :  { %v541_v12 = vpack.c.bf16 %v525_v9, %v524_v57 }
 0x12c   :  { %v540_v8 = vpack.c.bf16 %v523_v11, %v522_v10 }
 0x12e   :  { %1179 = vmatprep.mubr.bf16.mxu1 %v540_v8 }
 0x12f   :  { %1180 = vmatmul.mubr.bf16.gmra.mrb[24].mxu1 %v541_v12 }
 0x1ca   :  { %v1153_v13 = vpop.f32.mrb[32].mxu0 }
 0x1cb   :  { %773 = vst.msk [vmem:[#allocation2 + $0x10] sm:$0xff] %vm156_vm0, %v1153_v13  ;;  %v640_v14 = vpop.f32.mrb[33].mxu0 }
 0x1cc   :  { %771 = vst.msk [vmem:[#allocation2] sm:$0xff] %vm156_vm0, %v640_v14  ;;  %v1154_v15 = vpop.f32.mrb[34].mxu0 }
 0x1cd   :  { %774 = vst.msk [vmem:[#allocation2 + $0x18] sm:$0xff] %vm156_vm0, %v1154_v15  ;;  %v643_v16 = vpop.f32.mrb[35].mxu0 }
 0x1ce   :  { %772 = vst.msk [vmem:[#allocation2 + $0x8] sm:$0xff] %vm156_vm0, %v643_v16 }
 0x1d2   :  { %v908_v18 = vld [vmem:[#allocation2 + $0x10] sm:$0xff]  ;;  %v1157_v22 = vpop.f32.mrb[0].mxu1 }
 0x1d3   :  { %v947_v19 = vadd.f32 %v1517_v17, %v908_v18  ;;  %v906_v21 = vld [vmem:[#allocation2] sm:$0xff]  ;;  %777 = vst.msk [vmem:[#allocation2 + $0x30] sm:$0xff] %vm156_vm0, %v1157_v22  ;;  %v656_v27 = vpop.f32.mrb[1].mxu1 }
 0x1d4   :  { %v945_v24 = vadd.f32 %v1517_v17, %v906_v21  ;;  %v909_v25 = vld [vmem:[#allocation2 + $0x18] sm:$0xff]  ;;  %775 = vst.msk [vmem:[#allocation2 + $0x20] sm:$0xff] %vm156_vm0, %v656_v27  ;;  %v1158_v32 = vpop.f32.mrb[2].mxu1 }
 0x1d5   :  { %979 = vst.msk [vmem:[%s1712_s5 + $0x10] sm:$0xff] %vm156_vm0, %v947_v19  ;;  %v948_v30 = vadd.f32 %v1517_v17, %v909_v25  ;;  %v907_v31 = vld [vmem:[#allocation2 + $0x8] sm:$0xff]  ;;  %778 = vst.msk [vmem:[#allocation2 + $0x38] sm:$0xff] %vm156_vm0, %v1158_v32  ;;  %v659_v35 = vpop.f32.mrb[3].mxu1 }
 0x1d6   :  { %977 = vst.msk [vmem:[%s1712_s5] sm:$0xff] %vm156_vm0, %v945_v24  ;;  %v946_v33 = vadd.f32 %v1517_v17, %v907_v31  ;;  %776 = vst.msk [vmem:[#allocation2 + $0x28] sm:$0xff] %vm156_vm0, %v659_v35 }
 0x1d7   :  { %980 = vst.msk [vmem:[%s1712_s5 + $0x18] sm:$0xff] %vm156_vm0, %v948_v30 }
 0x1d8   :  { %978 = vst.msk [vmem:[%s1712_s5 + $0x8] sm:$0xff] %vm156_vm0, %v946_v33 }
 0x1da   :  { %v912_v36 = vld [vmem:[#allocation2 + $0x30] sm:$0xff]  ;;  %v1161_v37 = vpop.f32.mrb[4].mxu1 }
 0x1db   :  { %v951_v38 = vadd.f32 %v1517_v17, %v912_v36  ;;  %v910_v20 = vld [vmem:[#allocation2 + $0x20] sm:$0xff]  ;;  %781 = vst.msk [vmem:[#allocation2 + $0x50] sm:$0xff] %vm156_vm0, %v1161_v37  ;;  %v672_v23 = vpop.f32.mrb[5].mxu1 }
 0x1dc   :  { %v949_v39 = vadd.f32 %v1517_v17, %v910_v20  ;;  %v913_v41 = vld [vmem:[#allocation2 + $0x38] sm:$0xff]  ;;  %779 = vst.msk [vmem:[#allocation2 + $0x40] sm:$0xff] %vm156_vm0, %v672_v23  ;;  %v1162_v29 = vpop.f32.mrb[6].mxu1 }
 0x1dd   :  { %983 = vst.msk [vmem:[%s1712_s5 + $0x30] sm:$0xff] %vm156_vm0, %v951_v38  ;;  %v952_v28 = vadd.f32 %v1517_v17, %v913_v41  ;;  %v911_v34 = vld [vmem:[#allocation2 + $0x28] sm:$0xff]  ;;  %782 = vst.msk [vmem:[#allocation2 + $0x58] sm:$0xff] %vm156_vm0, %v1162_v29  ;;  %v675_v42 = vpop.f32.mrb[7].mxu1 }
 0x1de   :  { %981 = vst.msk [vmem:[%s1712_s5 + $0x20] sm:$0xff] %vm156_vm0, %v949_v39  ;;  %v950_v40 = vadd.f32 %v1517_v17, %v911_v34  ;;  %780 = vst.msk [vmem:[#allocation2 + $0x48] sm:$0xff] %vm156_vm0, %v675_v42 }
 0x1df   :  { %984 = vst.msk [vmem:[%s1712_s5 + $0x38] sm:$0xff] %vm156_vm0, %v952_v28 }
 0x1e0   :  { %982 = vst.msk [vmem:[%s1712_s5 + $0x28] sm:$0xff] %vm156_vm0, %v950_v40 }
 0x1e2   :  { %v916_v44 = vld [vmem:[#allocation2 + $0x50] sm:$0xff]  ;;  %v1165_v43 = vpop.f32.mrb[8].mxu1 }
 0x1e3   :  { %v955_v45 = vadd.f32 %v1517_v17, %v916_v44  ;;  %v914_v46 = vld [vmem:[#allocation2 + $0x40] sm:$0xff]  ;;  %785 = vst.msk [vmem:[#allocation2 + $0x70] sm:$0xff] %vm156_vm0, %v1165_v43  ;;  %v688_v47 = vpop.f32.mrb[9].mxu1 }
 0x1e4   :  { %v953_v49 = vadd.f32 %v1517_v17, %v914_v46  ;;  %v917_v50 = vld [vmem:[#allocation2 + $0x58] sm:$0xff]  ;;  %783 = vst.msk [vmem:[#allocation2 + $0x60] sm:$0xff] %vm156_vm0, %v688_v47  ;;  %v1166_v26 = vpop.f32.mrb[10].mxu1 }
 0x1e5   :  { %987 = vst.msk [vmem:[%s1712_s5 + $0x50] sm:$0xff] %vm156_vm0, %v955_v45  ;;  %v956_v51 = vadd.f32 %v1517_v17, %v917_v50  ;;  %v915_v53 = vld [vmem:[#allocation2 + $0x48] sm:$0xff]  ;;  %786 = vst.msk [vmem:[#allocation2 + $0x78] sm:$0xff] %vm156_vm0, %v1166_v26  ;;  %v691_v54 = vpop.f32.mrb[11].mxu1 }
 0x1e6   :  { %985 = vst.msk [vmem:[%s1712_s5 + $0x40] sm:$0xff] %vm156_vm0, %v953_v49  ;;  %v954_v56 = vadd.f32 %v1517_v17, %v915_v53  ;;  %784 = vst.msk [vmem:[#allocation2 + $0x68] sm:$0xff] %vm156_vm0, %v691_v54 }
 0x1e7   :  { %988 = vst.msk [vmem:[%s1712_s5 + $0x58] sm:$0xff] %vm156_vm0, %v956_v51 }
 0x1e8   :  { %986 = vst.msk [vmem:[%s1712_s5 + $0x48] sm:$0xff] %vm156_vm0, %v954_v56 }
 0x1ea   :  { %v920_v59 = vld [vmem:[#allocation2 + $0x70] sm:$0xff]  ;;  %v1169_v60 = vpop.f32.mrb[12].mxu1 }
 0x1eb   :  { %v959_v61 = vadd.f32 %v1517_v17, %v920_v59  ;;  %v918_v62 = vld [vmem:[#allocation2 + $0x60] sm:$0xff]  ;;  %789 = vst.msk [vmem:[#allocation2 + $0x90] sm:$0xff] %vm156_vm0, %v1169_v60  ;;  %v704_v0 = vpop.f32.mrb[13].mxu1 }
 0x1ec   :  { %v957_v1 = vadd.f32 %v1517_v17, %v918_v62  ;;  %v921_v2 = vld [vmem:[#allocation2 + $0x78] sm:$0xff]  ;;  %787 = vst.msk [vmem:[#allocation2 + $0x80] sm:$0xff] %vm156_vm0, %v704_v0  ;;  %v1170_v3 = vpop.f32.mrb[14].mxu1 }
 0x1ed   :  { %991 = vst.msk [vmem:[%s1712_s5 + $0x70] sm:$0xff] %vm156_vm0, %v959_v61  ;;  %v960_v52 = vadd.f32 %v1517_v17, %v921_v2  ;;  %v919_v5 = vld [vmem:[#allocation2 + $0x68] sm:$0xff]  ;;  %790 = vst.msk [vmem:[#allocation2 + $0x98] sm:$0xff] %vm156_vm0, %v1170_v3  ;;  %v707_v48 = vpop.f32.mrb[15].mxu1 }
 0x1ee   :  { %989 = vst.msk [vmem:[%s1712_s5 + $0x60] sm:$0xff] %vm156_vm0, %v957_v1  ;;  %v958_v4 = vadd.f32 %v1517_v17, %v919_v5  ;;  %788 = vst.msk [vmem:[#allocation2 + $0x88] sm:$0xff] %vm156_vm0, %v707_v48 }
 0x1ef   :  { %992 = vst.msk [vmem:[%s1712_s5 + $0x78] sm:$0xff] %vm156_vm0, %v960_v52 }
 0x1f0   :  { %990 = vst.msk [vmem:[%s1712_s5 + $0x68] sm:$0xff] %vm156_vm0, %v958_v4 }
 0x1f2   :  { %v924_v6 = vld [vmem:[#allocation2 + $0x90] sm:$0xff]  ;;  %v1173_v58 = vpop.f32.mrb[16].mxu1 }
 0x1f3   :  { %v963_v55 = vadd.f32 %v1517_v17, %v924_v6  ;;  %v922_v7 = vld [vmem:[#allocation2 + $0x80] sm:$0xff]  ;;  %793 = vst.msk [vmem:[#allocation2 + $0xb0] sm:$0xff] %vm156_vm0, %v1173_v58  ;;  %v720_v63 = vpop.f32.mrb[17].mxu1 }
 0x1f4   :  { %v961_v57 = vadd.f32 %v1517_v17, %v922_v7  ;;  %v925_v9 = vld [vmem:[#allocation2 + $0x98] sm:$0xff]  ;;  %791 = vst.msk [vmem:[#allocation2 + $0xa0] sm:$0xff] %vm156_vm0, %v720_v63  ;;  %v1174_v10 = vpop.f32.mrb[18].mxu1 }
 0x1f5   :  { %995 = vst.msk [vmem:[%s1712_s5 + $0x90] sm:$0xff] %vm156_vm0, %v963_v55  ;;  %v964_v11 = vadd.f32 %v1517_v17, %v925_v9  ;;  %v923_v12 = vld [vmem:[#allocation2 + $0x88] sm:$0xff]  ;;  %794 = vst.msk [vmem:[#allocation2 + $0xb8] sm:$0xff] %vm156_vm0, %v1174_v10  ;;  %v723_v8 = vpop.f32.mrb[19].mxu1 }
 0x1f6   :  { %993 = vst.msk [vmem:[%s1712_s5 + $0x80] sm:$0xff] %vm156_vm0, %v961_v57  ;;  %v962_v13 = vadd.f32 %v1517_v17, %v923_v12  ;;  %792 = vst.msk [vmem:[#allocation2 + $0xa8] sm:$0xff] %vm156_vm0, %v723_v8 }
 0x1f7   :  { %996 = vst.msk [vmem:[%s1712_s5 + $0x98] sm:$0xff] %vm156_vm0, %v964_v11 }
 0x1f8   :  { %994 = vst.msk [vmem:[%s1712_s5 + $0x88] sm:$0xff] %vm156_vm0, %v962_v13 }
 0x1fa   :  { %v928_v14 = vld [vmem:[#allocation2 + $0xb0] sm:$0xff]  ;;  %v1177_v15 = vpop.f32.mrb[20].mxu1 }
 0x1fb   :  { %v967_v16 = vadd.f32 %v1517_v17, %v928_v14  ;;  %v926_v18 = vld [vmem:[#allocation2 + $0xa0] sm:$0xff]  ;;  %797 = vst.msk [vmem:[#allocation2 + $0xd0] sm:$0xff] %vm156_vm0, %v1177_v15  ;;  %v736_v19 = vpop.f32.mrb[21].mxu1 }
 0x1fc   :  { %v965_v21 = vadd.f32 %v1517_v17, %v926_v18  ;;  %v929_v22 = vld [vmem:[#allocation2 + $0xb8] sm:$0xff]  ;;  %795 = vst.msk [vmem:[#allocation2 + $0xc0] sm:$0xff] %vm156_vm0, %v736_v19  ;;  %v1178_v24 = vpop.f32.mrb[22].mxu1 }
 0x1fd   :  { %999 = vst.msk [vmem:[%s1712_s5 + $0xb0] sm:$0xff] %vm156_vm0, %v967_v16  ;;  %v968_v25 = vadd.f32 %v1517_v17, %v929_v22  ;;  %v927_v27 = vld [vmem:[#allocation2 + $0xa8] sm:$0xff]  ;;  %798 = vst.msk [vmem:[#allocation2 + $0xd8] sm:$0xff] %vm156_vm0, %v1178_v24  ;;  %v739_v30 = vpop.f32.mrb[23].mxu1 }
 0x1fe   :  { %997 = vst.msk [vmem:[%s1712_s5 + $0xa0] sm:$0xff] %vm156_vm0, %v965_v21  ;;  %v966_v31 = vadd.f32 %v1517_v17, %v927_v27  ;;  %796 = vst.msk [vmem:[#allocation2 + $0xc8] sm:$0xff] %vm156_vm0, %v739_v30 }
 0x1ff   :  { %1000 = vst.msk [vmem:[%s1712_s5 + $0xb8] sm:$0xff] %vm156_vm0, %v968_v25 }
 0x200   :  { %998 = vst.msk [vmem:[%s1712_s5 + $0xa8] sm:$0xff] %vm156_vm0, %v966_v31 }
 0x202   :  { %v932_v32 = vld [vmem:[#allocation2 + $0xd0] sm:$0xff]  ;;  %v1181_v33 = vpop.f32.mrb[24].mxu1 }
 0x203   :  { %v971_v35 = vadd.f32 %v1517_v17, %v932_v32  ;;  %v930_v36 = vld [vmem:[#allocation2 + $0xc0] sm:$0xff]  ;;  %801 = vst.msk [vmem:[#allocation2 + $0xf0] sm:$0xff] %vm156_vm0, %v1181_v33  ;;  %v752_v37 = vpop.f32.mrb[25].mxu1 }
 0x204   :  { %v969_v38 = vadd.f32 %v1517_v17, %v930_v36  ;;  %v933_v20 = vld [vmem:[#allocation2 + $0xd8] sm:$0xff]  ;;  %799 = vst.msk [vmem:[#allocation2 + $0xe0] sm:$0xff] %vm156_vm0, %v752_v37  ;;  %v1182_v23 = vpop.f32.mrb[26].mxu1 }
 0x205   :  { %1003 = vst.msk [vmem:[%s1712_s5 + $0xd0] sm:$0xff] %vm156_vm0, %v971_v35  ;;  %v972_v39 = vadd.f32 %v1517_v17, %v933_v20  ;;  %v931_v41 = vld [vmem:[#allocation2 + $0xc8] sm:$0xff]  ;;  %802 = vst.msk [vmem:[#allocation2 + $0xf8] sm:$0xff] %vm156_vm0, %v1182_v23  ;;  %v755_v29 = vpop.f32.mrb[27].mxu1 }
 0x206   :  { %1001 = vst.msk [vmem:[%s1712_s5 + $0xc0] sm:$0xff] %vm156_vm0, %v969_v38  ;;  %v970_v28 = vadd.f32 %v1517_v17, %v931_v41  ;;  %800 = vst.msk [vmem:[#allocation2 + $0xe8] sm:$0xff] %vm156_vm0, %v755_v29 }
 0x207   :  { %1004 = vst.msk [vmem:[%s1712_s5 + $0xd8] sm:$0xff] %vm156_vm0, %v972_v39 }
 0x208   :  { %1002 = vst.msk [vmem:[%s1712_s5 + $0xc8] sm:$0xff] %vm156_vm0, %v970_v28 }
 0x20a   :  { %v936_v34 = vld [vmem:[#allocation2 + $0xf0] sm:$0xff] }
 0x20b   :  { %v975_v42 = vadd.f32 %v1517_v17, %v936_v34  ;;  %v934_v40 = vld [vmem:[#allocation2 + $0xe0] sm:$0xff] }
 0x20c   :  { %v973_v44 = vadd.f32 %v1517_v17, %v934_v40  ;;  %v937_v43 = vld [vmem:[#allocation2 + $0xf8] sm:$0xff] }
 0x20d   :  { %1007 = vst.msk [vmem:[%s1712_s5 + $0xf0] sm:$0xff] %vm156_vm0, %v975_v42  ;;  %v976_v45 = vadd.f32 %v1517_v17, %v937_v43  ;;  %v935_v46 = vld [vmem:[#allocation2 + $0xe8] sm:$0xff] }
 0x20e   :  { %1005 = vst.msk [vmem:[%s1712_s5 + $0xe0] sm:$0xff] %vm156_vm0, %v973_v44  ;;  %v974_v47 = vadd.f32 %v1517_v17, %v935_v46 }
 0x20f   :  { %1008 = vst.msk [vmem:[%s1712_s5 + $0xf8] sm:$0xff] %vm156_vm0, %v976_v45 }
 0x210   :  { %1006 = vst.msk [vmem:[%s1712_s5 + $0xe8] sm:$0xff] %vm156_vm0, %v974_v47 }

</bundles_post_ra>
